<compile_context>
chip_gen: v7x
topology: tpu7x:2x2x1
jax: 0.10.0
libtpu: 0.0.40
codegen_flags: <defaults>
</compile_context>

<pallas_src>
import functools
import math

import jax
import jax.numpy as jnp
from jax.experimental import pallas as pl
from jax.experimental.pallas import tpu as pltpu

LANE = 128


def _round_up(v, m):
    return (v + m - 1) // m * m


# ----------------------- phase 1: SAGEConv1 + ReLU -----------------------
def _layer1_kernel(adj_ref, xk_ref, xi_ref, w1_ref, b1_ref, h1_ref, acc_ref):
    k = pl.program_id(1)

    @pl.when(k == 0)
    def _():
        acc_ref[...] = jnp.zeros_like(acc_ref)

    # streaming mean aggregation: acc += adj[i, k] @ x[k]   (bf16 MXU, f32 accumulate)
    acc_ref[...] += jnp.dot(adj_ref[...], xk_ref[...].astype(jnp.bfloat16),
                            preferred_element_type=jnp.float32)

    @pl.when(k == pl.num_programs(1) - 1)
    def _():
        # fused [agg | x_root] @ [[W_l], [W_r]]  (single K = 2*Fpad matmul)
        feat = jnp.concatenate([acc_ref[...], xi_ref[...]], axis=-1)
        h = jnp.dot(feat, w1_ref[...], preferred_element_type=jnp.float32) + b1_ref[...]
        h1_ref[...] = jnp.maximum(h, 0.0)


# --------- phase 2: SAGEConv2 + ReLU + Linear(concat) + log_softmax ---------
def _layer2_kernel(adj_ref, h1k_ref, h1i_ref, w2_ref, b2_ref, wlin_ref, blin_ref,
                   out_ref, acc_ref, *, nclass):
    k = pl.program_id(1)

    @pl.when(k == 0)
    def _():
        acc_ref[...] = jnp.zeros_like(acc_ref)

    acc_ref[...] += jnp.dot(adj_ref[...], h1k_ref[...].astype(jnp.bfloat16),
                            preferred_element_type=jnp.float32)

    @pl.when(k == pl.num_programs(1) - 1)
    def _():
        h1i = h1i_ref[...]
        # SAGEConv2: fused [agg2 | h1_root] @ [[W2_l], [W2_r]]
        feat2 = jnp.concatenate([acc_ref[...], h1i], axis=-1)
        h2 = jnp.dot(feat2, w2_ref[...], preferred_element_type=jnp.float32) + b2_ref[...]
        h2 = jnp.maximum(h2, 0.0)
        # final Linear on concat([h1, h2]) with stacked weights
        feat3 = jnp.concatenate([h1i, h2], axis=-1)
        logits = (jnp.dot(feat3, wlin_ref[...], preferred_element_type=jnp.float32)
                  + blin_ref[...])
        # log_softmax over the real classes only (class dim is lane-padded)
        col = jax.lax.broadcasted_iota(jnp.int32, logits.shape, 1)
        valid = col < nclass
        masked = jnp.where(valid, logits, jnp.full_like(logits, -1e30))
        m = jnp.max(masked, axis=1, keepdims=True)
        z = masked - m
        lse = jnp.log(jnp.sum(jnp.exp(z), axis=1, keepdims=True))
        out_ref[...] = jnp.where(valid, z - lse, 0.0)


# ------------------------------ wrapper ------------------------------
def sage_forward(adj, x, params, nclass, *, tm=256, tk=256):
    """adj: [N, N] f32 row-normalized mean aggregation; x: [N, nfeat] f32."""
    N, nfeat = x.shape
    nhid = params["w1l"].shape[1]

    Fpad = _round_up(nfeat, LANE)
    Hpad = _round_up(nhid, LANE)
    Cpad = _round_up(nclass, LANE)
    Npad = _round_up(N, math.lcm(tm, tk))

    # pad & quantize the dominant stream (adj) to bf16; activations stay f32
    adj_p = jnp.zeros((Npad, Npad), jnp.bfloat16).at[:N, :N].set(adj.astype(jnp.bfloat16))
    x_p = jnp.zeros((Npad, Fpad), jnp.float32).at[:N, :nfeat].set(x)

    def pad2(w, r, c):
        return jnp.zeros((r, c), jnp.float32).at[:w.shape[0], :w.shape[1]].set(w)

    # stacked, lane-padded weights so each layer is a single fused matmul
    w1_p = jnp.concatenate([pad2(params["w1l"], Fpad, Hpad),
                            pad2(params["w1r"], Fpad, Hpad)], axis=0)      # (2F, H)
    b1_p = pad2(params["b1"], 1, Hpad)
    w2_p = jnp.concatenate([pad2(params["w2l"], Hpad, Hpad),
                            pad2(params["w2r"], Hpad, Hpad)], axis=0)      # (2H, H)
    b2_p = pad2(params["b2"], 1, Hpad)
    wlin_p = jnp.concatenate([pad2(params["wlin1"], Hpad, Cpad),
                              pad2(params["wlin2"], Hpad, Cpad)], axis=0)  # (2H, C)
    blin_p = pad2(params["blin"], 1, Cpad)

    grid = (Npad // tm, Npad // tk)
    cparams = pltpu.CompilerParams(
        dimension_semantics=("parallel", "arbitrary"),
        vmem_limit_bytes=32 * 1024 * 1024,
    )

    # ---- phase 1: h1 = ReLU(SAGEConv1(x)) ----
    h1 = pl.pallas_call(
        _layer1_kernel,
        out_shape=jax.ShapeDtypeStruct((Npad, Hpad), jnp.float32),
        grid_spec=pltpu.PrefetchScalarGridSpec(
            num_scalar_prefetch=0,
            grid=grid,
            in_specs=[
                pl.BlockSpec((tm, tk), lambda i, k: (i, k)),          # adj tile (bf16 stream)
                pl.BlockSpec((tk, Fpad), lambda i, k: (k, 0)),        # x rows for aggregation
                pl.BlockSpec((tm, Fpad), lambda i, k: (i, 0)),        # x rows (root term)
                pl.BlockSpec((2 * Fpad, Hpad), lambda i, k: (0, 0)),  # stacked W1 (resident)
                pl.BlockSpec((1, Hpad), lambda i, k: (0, 0)),         # b1 (resident)
            ],
            out_specs=pl.BlockSpec((tm, Hpad), lambda i, k: (i, 0)),
            scratch_shapes=[pltpu.VMEM((tm, Fpad), jnp.float32)],
        ),
        compiler_params=cparams,
    )(adj_p, x_p, x_p, w1_p, b1_p)

    # ---- phase 2: SAGEConv2 + ReLU + Linear(concat[h1,h2]) + log_softmax ----
    out = pl.pallas_call(
        functools.partial(_layer2_kernel, nclass=nclass),
        out_shape=jax.ShapeDtypeStruct((Npad, Cpad), jnp.float32),
        grid_spec=pltpu.PrefetchScalarGridSpec(
            num_scalar_prefetch=0,
            grid=grid,
            in_specs=[
                pl.BlockSpec((tm, tk), lambda i, k: (i, k)),          # adj tile (bf16 stream)
                pl.BlockSpec((tk, Hpad), lambda i, k: (k, 0)),        # h1 rows for aggregation
                pl.BlockSpec((tm, Hpad), lambda i, k: (i, 0)),        # h1 rows (root / concat)
                pl.BlockSpec((2 * Hpad, Hpad), lambda i, k: (0, 0)),  # stacked W2 (resident)
                pl.BlockSpec((1, Hpad), lambda i, k: (0, 0)),         # b2 (resident)
                pl.BlockSpec((2 * Hpad, Cpad), lambda i, k: (0, 0)),  # stacked Wlin (resident)
                pl.BlockSpec((1, Cpad), lambda i, k: (0, 0)),         # blin (resident)
            ],
            out_specs=pl.BlockSpec((tm, Cpad), lambda i, k: (i, 0)),
            scratch_shapes=[pltpu.VMEM((tm, Hpad), jnp.float32)],
        ),
        compiler_params=cparams,
    )(adj_p, h1, h1, w2_p, b2_p, wlin_p, blin_p)

    return out[:N, :nclass]


# ------------------------------ graph / params ------------------------------
def build_mean_adj(edge_index, num_nodes, edge_weight=None):
    """Dense row-normalized mean aggregation: adj[i, j] = w(j->i) / sum_w_in(i)."""
    src, dst = edge_index[0], edge_index[1]
    w = (jnp.ones(src.shape[0], jnp.float32) if edge_weight is None
         else edge_weight.astype(jnp.float32))
    adj = jnp.zeros((num_nodes, num_nodes), jnp.float32).at[dst, src].add(w)
    deg = jnp.zeros((num_nodes,), jnp.float32).at[dst].add(w)
    deg = jnp.where(deg > 0, deg, 1.0)
    return adj / deg[:, None]


def init_params(key, nfeat, nhid, nclass):
    ks = jax.random.split(key, 7)
    s = lambda fan_in: 1.0 / jnp.sqrt(jnp.float32(fan_in))
    return {
        # SAGEConv layer 1 (nfeat -> nhid): lin_l (neighbors) + lin_r (root) + bias
        "w1l": jax.random.normal(ks[0], (nfeat, nhid), jnp.float32) * s(nfeat),
        "w1r": jax.random.normal(ks[1], (nfeat, nhid), jnp.float32) * s(nfeat),
        "b1":  jnp.zeros((1, nhid), jnp.float32),
        # SAGEConv layer 2 (nhid -> nhid)
        "w2l": jax.random.normal(ks[2], (nhid, nhid), jnp.float32) * s(nhid),
        "w2r": jax.random.normal(ks[3], (nhid, nhid), jnp.float32) * s(nhid),
        "b2":  jnp.zeros((1, nhid), jnp.float32),
        # final Linear(nhid * 2 -> nclass), split into the two concat halves
        "wlin1": jax.random.normal(ks[4], (nhid, nclass), jnp.float32) * s(2 * nhid),
        "wlin2": jax.random.normal(ks[5], (nhid, nclass), jnp.float32) * s(2 * nhid),
        "blin":  jax.random.normal(ks[6], (1, nclass), jnp.float32) * s(2 * nhid),
    }


def sage_reference(adj, x, p):
    agg1 = adj @ x
    h1 = jnp.maximum(agg1 @ p["w1l"] + x @ p["w1r"] + p["b1"], 0.0)
    agg2 = adj @ h1
    h2 = jnp.maximum(agg2 @ p["w2l"] + h1 @ p["w2r"] + p["b2"], 0.0)
    logits = h1 @ p["wlin1"] + h2 @ p["wlin2"] + p["blin"]
    return jax.nn.log_softmax(logits, axis=1)


if __name__ == "__main__":
    N, nfeat, nhid, nclass, n_edges = 16, 8, 32, 4, 48

    key = jax.random.PRNGKey(0)
    k_x, k_e1, k_e2, k_p = jax.random.split(key, 4)

    x = jax.random.normal(k_x, (N, nfeat), jnp.float32)
    src = jax.random.randint(k_e1, (n_edges,), 0, N)
    dst = jax.random.randint(k_e2, (n_edges,), 0, N)
    edge_index = jnp.stack([src, dst], axis=0)  # [2, E], row 0 = source, row 1 = target

    adj = build_mean_adj(edge_index, N)  # edge_weight=None
    params = init_params(k_p, nfeat, nhid, nclass)

    out = jax.block_until_ready(sage_forward(adj, x, params, nclass))
    ref = sage_reference(adj, x, params)

    assert out.shape == (N, nclass)
    max_err = float(jnp.max(jnp.abs(out - ref)))
    # adj (and the aggregation operands) are bf16-quantized; accumulation stays f32.
    assert max_err < 2e-2, f"mismatch vs reference: max abs err {max_err}"
    # TODO(synk): dropout is implemented as inference-mode identity (training=False).
    print("KERNEL_OK")
</pallas_src>

<mosaic_0001>
module attributes {stable_mosaic.version = 11 : i64} {
  func.func @_layer1_kernel(%arg0: i32, %arg1: i32, %arg2: memref<256x256xbf16, #tpu.memory_space<vmem>>, %arg3: memref<256x128xf32, #tpu.memory_space<vmem>>, %arg4: memref<256x128xf32, #tpu.memory_space<vmem>>, %arg5: memref<256x128xf32, #tpu.memory_space<vmem>>, %arg6: memref<1x128xf32, #tpu.memory_space<vmem>>, %arg7: memref<256x128xf32, #tpu.memory_space<vmem>>, %arg8: memref<256x128xf32, #tpu.memory_space<vmem>>) attributes {dimension_semantics = [#tpu.dimension_semantics<parallel>, #tpu.dimension_semantics<arbitrary>], iteration_bounds = array<i64: 1, 1>, scalar_prefetch = 0 : i64, scratch_operands = 1 : i64, tpu.core_type = #tpu.core_type<tc>, window_params = [{transform_indices = @transform_0, window_bounds = array<i64: 256, 256>}, {transform_indices = @transform_1, window_bounds = array<i64: 256, 128>}, {transform_indices = @transform_2, window_bounds = array<i64: 256, 128>}, {pipeline_mode = #tpu.pipeline_mode<synchronous>, transform_indices = @transform_3, window_bounds = array<i64: 256, 128>}, {pipeline_mode = #tpu.pipeline_mode<synchronous>, transform_indices = @transform_4, window_bounds = array<i64: 1, 128>}, {transform_indices = @transform_5, window_bounds = array<i64: 256, 128>}]} {
    %c0_i32 = arith.constant 0 : i32
    %0 = arith.cmpi eq, %arg1, %c0_i32 : i32
    %1 = arith.extui %0 : i1 to i32
    %c0_i32_0 = arith.constant 0 : i32
    %2 = arith.cmpi ne, %1, %c0_i32_0 : i32
    scf.if %2 {
      %cst_10 = arith.constant 0.000000e+00 : f32
      %13 = vector.broadcast %cst_10 : f32 to vector<256x128xf32>
      %c0_11 = arith.constant 0 : index
      %c0_12 = arith.constant 0 : index
      %14 = vector.load %arg8[%c0_11, %c0_12] : memref<256x128xf32, #tpu.memory_space<vmem>>, vector<256x128xf32>
      tpu.vector_store %arg8[%c0_11, %c0_12], %13 {strides = array<i32>} : memref<256x128xf32, #tpu.memory_space<vmem>>, vector<256x128xf32>,
    } else {
    }
    %c0 = arith.constant 0 : index
    %c0_1 = arith.constant 0 : index
    %3 = vector.load %arg8[%c0, %c0_1] : memref<256x128xf32, #tpu.memory_space<vmem>>, vector<256x128xf32>
    %c0_2 = arith.constant 0 : index
    %c0_3 = arith.constant 0 : index
    %4 = vector.load %arg2[%c0_2, %c0_3] : memref<256x256xbf16, #tpu.memory_space<vmem>>, vector<256x256xbf16>
    %c0_4 = arith.constant 0 : index
    %c0_5 = arith.constant 0 : index
    %5 = vector.load %arg3[%c0_4, %c0_5] : memref<256x128xf32, #tpu.memory_space<vmem>>, vector<256x128xf32>
    %6 = arith.truncf %5 : vector<256x128xf32> to vector<256x128xbf16>
    %cst = arith.constant dense<0.000000e+00> : vector<256x128xf32>
    %7 = tpu.matmul %4, %6, %cst {dimension_numbers = #tpu.dot_dimension_numbers<[1], [0], [0], [1], [0, 0, 1, 1], [], []>} : vector<256x256xbf16>, vector<256x128xbf16>, vector<256x128xf32> -> vector<256x128xf32>
    %8 = arith.addf %3, %7 : vector<256x128xf32>
    %c0_6 = arith.constant 0 : index
    %c0_7 = arith.constant 0 : index
    %9 = vector.load %arg8[%c0_6, %c0_7] : memref<256x128xf32, #tpu.memory_space<vmem>>, vector<256x128xf32>
    tpu.vector_store %arg8[%c0_6, %c0_7], %8 {strides = array<i32>} : memref<256x128xf32, #tpu.memory_space<vmem>>, vector<256x128xf32>,
    %c0_i32_8 = arith.constant 0 : i32
    %10 = arith.cmpi eq, %arg1, %c0_i32_8 : i32
    %11 = arith.extui %10 : i1 to i32
    %c0_i32_9 = arith.constant 0 : i32
    %12 = arith.cmpi ne, %11, %c0_i32_9 : i32
    scf.if %12 {
      %c0_10 = arith.constant 0 : index
      %c0_11 = arith.constant 0 : index
      %13 = vector.load %arg8[%c0_10, %c0_11] : memref<256x128xf32, #tpu.memory_space<vmem>>, vector<256x128xf32>
      %c0_12 = arith.constant 0 : index
      %c0_13 = arith.constant 0 : index
      %14 = vector.load %arg4[%c0_12, %c0_13] : memref<256x128xf32, #tpu.memory_space<vmem>>, vector<256x128xf32>
      %15 = tpu.concatenate %13, %14 in 1 : vector<256x128xf32>, vector<256x128xf32> -> vector<256x256xf32>
      %c0_14 = arith.constant 0 : index
      %c0_15 = arith.constant 0 : index
      %16 = vector.load %arg5[%c0_14, %c0_15] : memref<256x128xf32, #tpu.memory_space<vmem>>, vector<256x128xf32>
      %cst_16 = arith.constant dense<0.000000e+00> : vector<256x128xf32>
      %17 = tpu.matmul %15, %16, %cst_16 {dimension_numbers = #tpu.dot_dimension_numbers<[1], [0], [0], [1], [0, 0, 1, 1], [], []>} : vector<256x256xf32>, vector<256x128xf32>, vector<256x128xf32> -> vector<256x128xf32>
      %c0_17 = arith.constant 0 : index
      %c0_18 = arith.constant 0 : index
      %18 = vector.load %arg6[%c0_17, %c0_18] : memref<1x128xf32, #tpu.memory_space<vmem>>, vector<1x128xf32>
      %19 = vector.broadcast %18 : vector<1x128xf32> to vector<256x128xf32>
      %20 = arith.addf %17, %19 : vector<256x128xf32>
      %cst_19 = arith.constant 0.000000e+00 : f32
      %21 = vector.broadcast %cst_19 : f32 to vector<256x128xf32>
      %22 = arith.maximumf %20, %21 : vector<256x128xf32>
      %c0_20 = arith.constant 0 : index
      %c0_21 = arith.constant 0 : index
      %23 = vector.load %arg7[%c0_20, %c0_21] : memref<256x128xf32, #tpu.memory_space<vmem>>, vector<256x128xf32>
      tpu.vector_store %arg7[%c0_20, %c0_21], %22 {strides = array<i32>} : memref<256x128xf32, #tpu.memory_space<vmem>>, vector<256x128xf32>,
    } else {
    }
    return
  }
  func.func @transform_0(%arg0: i32, %arg1: i32) -> (i32, i32) {
    %c0_i32 = arith.constant 0 : i32
    return %arg0, %arg1 : i32, i32
  }
  func.func @transform_1(%arg0: i32, %arg1: i32) -> (i32, i32) {
    %c0_i32 = arith.constant 0 : i32
    %c0_i32_0 = arith.constant 0 : i32
    return %arg1, %c0_i32 : i32, i32
  }
  func.func @transform_2(%arg0: i32, %arg1: i32) -> (i32, i32) {
    %c0_i32 = arith.constant 0 : i32
    %c0_i32_0 = arith.constant 0 : i32
    return %arg0, %c0_i32 : i32, i32
  }
  func.func @transform_3(%arg0: i32, %arg1: i32) -> (i32, i32) {
    %c0_i32 = arith.constant 0 : i32
    %c0_i32_0 = arith.constant 0 : i32
    %c0_i32_1 = arith.constant 0 : i32
    return %c0_i32, %c0_i32_0 : i32, i32
  }
  func.func @transform_4(%arg0: i32, %arg1: i32) -> (i32, i32) {
    %c0_i32 = arith.constant 0 : i32
    %c0_i32_0 = arith.constant 0 : i32
    %c0_i32_1 = arith.constant 0 : i32
    return %c0_i32, %c0_i32_0 : i32, i32
  }
  func.func @transform_5(%arg0: i32, %arg1: i32) -> (i32, i32) {
    %c0_i32 = arith.constant 0 : i32
    %c0_i32_0 = arith.constant 0 : i32
    return %arg0, %c0_i32 : i32, i32
  }
}

</mosaic_0001>

<bundles_post_ra>
// kernel: tpu_custom_call.1
= control target key start
LH: loop header
LB: loop body
LE: loop exit
PB: predicated region body
PF: predicated region fallthrough
CT: control target
= control target key end

     0   :  { %10 = vsyncpa [#allocation4], 0  ;;  %s1619_s0 = inlined_call_operand.hbm [shape: bf16[256,256], index: 0, kind: input, shape index: {}]   ;;  %s1620_s1 = inlined_call_operand.hbm [shape: f32[256,128], index: 1, kind: input, shape index: {}]   ;;  %s1621_s2 = inlined_call_operand.hbm [shape: f32[256,128], index: 2, kind: input, shape index: {}]   ;;  %s1622_s3 = inlined_call_operand.hbm [shape: f32[256,128], index: 3, kind: input, shape index: {}]   ;;  %s1623_s4 = inlined_call_operand.vmem [shape: f32[1,128], index: 4, kind: input, shape index: {}]   ;;  %s1624_s5 = inlined_call_operand.hbm [shape: f32[256,128], index: 5, kind: output, shape index: {}]  }
   0x1   :  { %11 = vsyncpa [#allocation7], 0 }
   0x2   :  { %12 = vsyncpa [#allocation10], 0 }
   0x3   :  { %13 = vsyncpa [#allocation5], 0  ;;  %s1423_s18 = smov [#allocation6]   ;;  %s1424_s20 = smov [#allocation3]  }
   0x4   :  { %s31_s19 = sshll.u32 %s1423_s18, 4  ;;  %s19_s21 = sshll.u32 %s1424_s20, 4  ;;  %s32_s19 = int_to_ptr.vmem [resolvable:$true] %s31_s19  ;;  %s1461_s21 = int_to_ptr.vmem [resolvable:$true] %s19_s21 }
   0x5   :  { %s1305_s24 = scalar_lea.hbm %s1620_s1, 4096 }
   0x6   :  { %p1306_p0 = scmp.ne.s32.totalorder %s1620_s1, %s1305_s24  ;;  %p1309_p1 = scmp.lt.u32.totalorder %s1305_s24, %s1620_s1 }
   0x8   :  { %p1311_p2 = pnand %p1309_p1, %p1306_p0 }
   0xa   :  { %1314 = shalt.err (!%p1311_p2)
}
   0xb   :  { %s1315_s29 = scalar_lea.vmem %s32_s19, 4096  ;;  %p1320_p4 = scmp.lt.s32.totalorder %s32_s19, %s32_s19 }
   0xc   :  { %p1316_p3 = scmp.ne.s32.totalorder %s32_s19, %s1315_s29  ;;  %p1321_p5 = scmp.lt.s32.totalorder %s1315_s29, %s1315_s29 }
   0xe   :  { %p1322_p6 = por %p1321_p5, %p1320_p4 }
  0x10   :  { %p1323_p7 = pnand %p1322_p6, %p1316_p3 }
  0x12   :  { %1326 = shalt.err (!%p1323_p7)
}
  0x13   :  { %s1425_s30 = smov 128   ;;  %s1426_s6 = smov 8  }
  0x14   :  { %37 = dma.hbm_to_vmem [thread:$0]  %s1620_s1, 4096, %s32_s19, [#allocation7], %s1425_s30, %s1425_s30, %s1426_s6  }
  0x15   :  { %s1327_s11 = scalar_lea.hbm %s1619_s0, 4096 }
  0x16   :  { %p1328_p8 = scmp.ne.s32.totalorder %s1619_s0, %s1327_s11  ;;  %p1331_p9 = scmp.lt.u32.totalorder %s1327_s11, %s1619_s0 }
  0x18   :  { %p1333_p10 = pnand %p1331_p9, %p1328_p8 }
  0x1a   :  { %1336 = shalt.err (!%p1333_p10)
}
  0x1b   :  { %s1337_s16 = scalar_lea.vmem %s1461_s21, 4096  ;;  %p1342_p12 = scmp.lt.s32.totalorder %s1461_s21, %s1461_s21 }
  0x1c   :  { %p1338_p11 = scmp.ne.s32.totalorder %s1461_s21, %s1337_s16  ;;  %p1343_p13 = scmp.lt.s32.totalorder %s1337_s16, %s1337_s16 }
  0x1e   :  { %p1344_p0 = por %p1343_p13, %p1342_p12 }
  0x20   :  { %p1345_p1 = pnand %p1344_p0, %p1338_p11 }
  0x22   :  { %1348 = shalt.err (!%p1345_p1)
}
  0x23   :  { %25 = dma.hbm_to_vmem [thread:$0]  %s1619_s0, 4096, %s1461_s21, [#allocation4], %s1425_s30, %s1425_s30, %s1426_s6  }
  0x24   :  { %s1427_s18 = smov [#allocation8]   ;;  %s1428_s20 = smov [#allocation9]  }
  0x25   :  { %s43_s19 = sshll.u32 %s1427_s18, 4  ;;  %s55_s22 = sshll.u32 %s1428_s20, 4  ;;  %s44_s19 = int_to_ptr.vmem [resolvable:$true] %s43_s19  ;;  %s1498_s22 = int_to_ptr.vmem [resolvable:$true] %s55_s22 }
  0x26   :  { %s1349_s25 = scalar_lea.hbm %s1621_s2, 4096 }
  0x27   :  { %p1350_p2 = scmp.ne.s32.totalorder %s1621_s2, %s1349_s25  ;;  %p1353_p3 = scmp.lt.u32.totalorder %s1349_s25, %s1621_s2 }
  0x29   :  { %p1355_p4 = pnand %p1353_p3, %p1350_p2 }
  0x2b   :  { %1358 = shalt.err (!%p1355_p4)
}
  0x2c   :  { %s1359_s0 = scalar_lea.vmem %s44_s19, 4096  ;;  %p1364_p6 = scmp.lt.s32.totalorder %s44_s19, %s44_s19 }
  0x2d   :  { %p1360_p5 = scmp.ne.s32.totalorder %s44_s19, %s1359_s0  ;;  %p1365_p7 = scmp.lt.s32.totalorder %s1359_s0, %s1359_s0 }
  0x2f   :  { %p1366_p8 = por %p1365_p7, %p1364_p6 }
  0x31   :  { %p1367_p9 = pnand %p1366_p8, %p1360_p5 }
  0x33   :  { %1370 = shalt.err (!%p1367_p9)
}
  0x34   :  { %49 = dma.hbm_to_vmem [thread:$0]  %s1621_s2, 4096, %s44_s19, [#allocation7], %s1425_s30, %s1425_s30, %s1426_s6  }
  0x35   :  { %s1371_s10 = scalar_lea.hbm %s1622_s3, 4096 }
  0x36   :  { %p1372_p10 = scmp.ne.s32.totalorder %s1622_s3, %s1371_s10  ;;  %p1375_p11 = scmp.lt.u32.totalorder %s1371_s10, %s1622_s3 }
  0x38   :  { %p1377_p12 = pnand %p1375_p11, %p1372_p10 }
  0x3a   :  { %1380 = shalt.err (!%p1377_p12)
}
  0x3b   :  { %s1381_s15 = scalar_lea.vmem %s1498_s22, 4096  ;;  %p1386_p0 = scmp.lt.s32.totalorder %s1498_s22, %s1498_s22 }
  0x3c   :  { %p1382_p13 = scmp.ne.s32.totalorder %s1498_s22, %s1381_s15  ;;  %p1387_p1 = scmp.lt.s32.totalorder %s1381_s15, %s1381_s15 }
  0x3e   :  { %p1388_p2 = por %p1387_p1, %p1386_p0 }
  0x40   :  { %p1389_p3 = pnand %p1388_p2, %p1382_p13 }
  0x42   :  { %1392 = shalt.err (!%p1389_p3)
}
  0x43   :  { %61 = dma.hbm_to_vmem [thread:$0]  %s1622_s3, 4096, %s1498_s22, [#allocation10], %s1425_s30, %s1425_s30, %s1426_s6  }
  0x44   :  { %1415 = dma.done.wait [#allocation4], 4096  }
  0x45   :  { %1416 = vsyncadd [#allocation4], 4294963200 }
  0x46   :  { %1417 = dma.done.wait [#allocation7], 8192  }
  0x47   :  { %1418 = vsyncadd [#allocation7], 4294959104 }
  0x48   :  { %1419 = dma.done.wait [#allocation10], 4096  }
  0x49   :  { %1420 = vsyncadd [#allocation10], 4294963200  ;;  %v193_v0 = vld [vmem:[#allocation6 + $0x80] sm:$0xff]  ;;  %v194_v1 = vld [vmem:[#allocation6 + $0x88] sm:$0xff]  ;;  %v1429_v49 = vmov 0.0|0.0  }
  0x4a   :  { %v177_v2 = vld [vmem:[#allocation6] sm:$0xff]  ;;  %v217_v3 = vpack.c.bf16 %v194_v1, %v193_v0  ;;  %v178_v4 = vld [vmem:[#allocation6 + $0x8] sm:$0xff]  ;;  %v195_v5 = vld [vmem:[#allocation6 + $0x90] sm:$0xff]  ;;  %1217 = vmatprep.subr.bf16.mxu1 %v1429_v49 }
  0x4b   :  { %v196_v6 = vld [vmem:[#allocation6 + $0x98] sm:$0xff]  ;;  %v209_v7 = vpack.c.bf16 %v178_v4, %v177_v2  ;;  %v179_v9 = vld [vmem:[#allocation6 + $0x10] sm:$0xff]  ;;  %v197_v11 = vld [vmem:[#allocation6 + $0xa0] sm:$0xff] }
  0x4c   :  { %v218_v8 = vpack.c.bf16 %v196_v6, %v195_v5  ;;  %v180_v10 = vld [vmem:[#allocation6 + $0x18] sm:$0xff]  ;;  %1057 = vmatprep.subr.bf16.mxu0 %v217_v3  ;;  %v198_v12 = vld [vmem:[#allocation6 + $0xa8] sm:$0xff]  ;;  %v181_v15 = vld [vmem:[#allocation6 + $0x20] sm:$0xff] }
  0x4d   :  { %1058 = vmatpush3.bf16.msra.mxu0 %v209_v7  ;;  %v210_v13 = vpack.c.bf16 %v180_v10, %v179_v9  ;;  %v219_v14 = vpack.c.bf16 %v198_v12, %v197_v11  ;;  %v182_v16 = vld [vmem:[#allocation6 + $0x28] sm:$0xff]  ;;  %v199_v17 = vld [vmem:[#allocation6 + $0xb0] sm:$0xff]  ;;  %v200_v18 = vld [vmem:[#allocation6 + $0xb8] sm:$0xff] }
  0x4e   :  { %1059 = vmatprep.subr.bf16.mxu0 %v218_v8  ;;  %v211_v19 = vpack.c.bf16 %v182_v16, %v181_v15  ;;  %v220_v20 = vpack.c.bf16 %v200_v18, %v199_v17  ;;  %v183_v21 = vld [vmem:[#allocation6 + $0x30] sm:$0xff]  ;;  %v184_v22 = vld [vmem:[#allocation6 + $0x38] sm:$0xff]  ;;  %v201_v23 = vld [vmem:[#allocation6 + $0xc0] sm:$0xff] }
  0x4f   :  { %v202_v24 = vld [vmem:[#allocation6 + $0xc8] sm:$0xff]  ;;  %v212_v26 = vpack.c.bf16 %v184_v22, %v183_v21  ;;  %v185_v27 = vld [vmem:[#allocation6 + $0x40] sm:$0xff]  ;;  %v203_v30 = vld [vmem:[#allocation6 + $0xd0] sm:$0xff] }
  0x50   :  { %v1259_v25 = vld [vmem:[#allocation3 + $0x4] ss:$8 sps:$4 sm:$0xff]   ;;  %v221_v28 = vpack.c.bf16 %v202_v24, %v201_v23  ;;  %v204_v31 = vld [vmem:[#allocation6 + $0xd8] sm:$0xff]  ;;  %v187_v33 = vld [vmem:[#allocation6 + $0x50] sm:$0xff] }
  0x51   :  { %1060 = vmatpush3.bf16.msra.mxu0 %v210_v13  ;;  %v186_v29 = vld [vmem:[#allocation6 + $0x48] sm:$0xff]  ;;  %417 = vmatprep.mubr.bf16.mxu0 %v1259_v25  ;;  %v222_v34 = vpack.c.bf16 %v204_v31, %v203_v30  ;;  %v188_v35 = vld [vmem:[#allocation6 + $0x58] sm:$0xff]  ;;  %v205_v36 = vld [vmem:[#allocation6 + $0xe0] sm:$0xff] }
  0x52   :  { %1061 = vmatprep.subr.bf16.mxu0 %v219_v14  ;;  %v213_v32 = vpack.c.bf16 %v186_v29, %v185_v27  ;;  %v206_v37 = vld [vmem:[#allocation6 + $0xe8] sm:$0xff]  ;;  %v214_v38 = vpack.c.bf16 %v188_v35, %v187_v33  ;;  %v189_v39 = vld [vmem:[#allocation6 + $0x60] sm:$0xff]  ;;  %v207_v42 = vld [vmem:[#allocation6 + $0xf0] sm:$0xff] }
  0x53   :  { %v223_v40 = vpack.c.bf16 %v206_v37, %v205_v36  ;;  %v190_v41 = vld [vmem:[#allocation6 + $0x68] sm:$0xff]  ;;  %v208_v43 = vld [vmem:[#allocation6 + $0xf8] sm:$0xff]  ;;  %v191_v45 = vld [vmem:[#allocation6 + $0x70] sm:$0xff] }
  0x54   :  { %v215_v44 = vpack.c.bf16 %v190_v41, %v189_v39  ;;  %v224_v46 = vpack.c.bf16 %v208_v43, %v207_v42  ;;  %v192_v47 = vld [vmem:[#allocation6 + $0x78] sm:$0xff]  ;;  %v1257_v50 = vld [vmem:[#allocation3] ss:$8 sps:$4 sm:$0xff]   ;;  %v679_v55 = vld [vmem:[#allocation9 + $0x10] sm:$0xff] }
  0x55   :  { %1062 = vmatpush3.bf16.msra.mxu0 %v211_v19  ;;  %v216_v48 = vpack.c.bf16 %v192_v47, %v191_v45  ;;  %v1260_v51 = vld [vmem:[#allocation3 + $0x14] ss:$8 sps:$4 sm:$0xff]   ;;  %v677_v52 = vld [vmem:[#allocation9] sm:$0xff]  ;;  %v678_v53 = vld [vmem:[#allocation9 + $0x8] sm:$0xff] }
  0x56   :  { %1063 = vmatprep.subr.bf16.mxu0 %v220_v20  ;;  %v1170_v54 = vpack.c.bf16 %v678_v53, %v677_v52  ;;  %v680_v56 = vld [vmem:[#allocation9 + $0x18] sm:$0xff]  ;;  %v681_v58 = vld [vmem:[#allocation9 + $0x20] sm:$0xff]  ;;  %v682_v59 = vld [vmem:[#allocation9 + $0x28] sm:$0xff] }
  0x57   :  { %v1173_v57 = vpack.c.bf16 %v680_v56, %v679_v55  ;;  %v1262_v60 = vld [vmem:[#allocation3 + $0x10] ss:$8 sps:$4 sm:$0xff]   ;;  %v1263_v61 = vld [vmem:[#allocation3 + $0x24] ss:$8 sps:$4 sm:$0xff]   ;;  %v1176_v62 = vpack.c.bf16 %v682_v59, %v681_v58  ;;  %v1265_v4 = vld [vmem:[#allocation3 + $0x20] ss:$8 sps:$4 sm:$0xff]  }
  0x58   :  { %1233 = vmatpush1.bf16.msra.mxu1 %v1170_v54  ;;  %v683_v63 = vld [vmem:[#allocation9 + $0x30] sm:$0xff]  ;;  %v684_v0 = vld [vmem:[#allocation9 + $0x38] sm:$0xff]  ;;  %v685_v2 = vld [vmem:[#allocation9 + $0x40] sm:$0xff] }
  0x59   :  { %1064 = vmatpush3.bf16.msra.mxu0 %v212_v26  ;;  %1218 = vmatprep.subr.bf16.mxu1 %v1429_v49  ;;  %v1179_v1 = vpack.c.bf16 %v684_v0, %v683_v63  ;;  %v686_v3 = vld [vmem:[#allocation9 + $0x48] sm:$0xff]  ;;  %v1266_v5 = vld [vmem:[#allocation3 + $0x34] ss:$8 sps:$4 sm:$0xff]   ;;  %v689_v10 = vld [vmem:[#allocation9 + $0x60] sm:$0xff] }
  0x5a   :  { %1065 = vmatprep.subr.bf16.mxu0 %v221_v28  ;;  %v1182_v6 = vpack.c.bf16 %v686_v3, %v685_v2  ;;  %v687_v7 = vld [vmem:[#allocation9 + $0x50] sm:$0xff]  ;;  %v688_v8 = vld [vmem:[#allocation9 + $0x58] sm:$0xff]  ;;  %v690_v11 = vld [vmem:[#allocation9 + $0x68] sm:$0xff] }
  0x5b   :  { %v1185_v9 = vpack.c.bf16 %v688_v8, %v687_v7  ;;  %v1268_v12 = vld [vmem:[#allocation3 + $0x30] ss:$8 sps:$4 sm:$0xff]   ;;  %v1269_v13 = vld [vmem:[#allocation3 + $0x44] ss:$8 sps:$4 sm:$0xff]   ;;  %v1188_v14 = vpack.c.bf16 %v690_v11, %v689_v10  ;;  %v1271_v20 = vld [vmem:[#allocation3 + $0x40] ss:$8 sps:$4 sm:$0xff]  }
  0x5c   :  { %1234 = vmatpush1.bf16.msra.mxu1 %v1173_v57  ;;  %v691_v15 = vld [vmem:[#allocation9 + $0x70] sm:$0xff]  ;;  %v692_v16 = vld [vmem:[#allocation9 + $0x78] sm:$0xff]  ;;  %v693_v18 = vld [vmem:[#allocation9 + $0x80] sm:$0xff] }
  0x5d   :  { %1066 = vmatpush3.bf16.msra.mxu0 %v213_v32  ;;  %1219 = vmatprep.subr.bf16.mxu1 %v1429_v49  ;;  %v1191_v17 = vpack.c.bf16 %v692_v16, %v691_v15  ;;  %v694_v19 = vld [vmem:[#allocation9 + $0x88] sm:$0xff]  ;;  %v1272_v21 = vld [vmem:[#allocation3 + $0x54] ss:$8 sps:$4 sm:$0xff]   ;;  %v697_v26 = vld [vmem:[#allocation9 + $0xa0] sm:$0xff] }
  0x5e   :  { %1067 = vmatprep.subr.bf16.mxu0 %v222_v34  ;;  %v1194_v22 = vpack.c.bf16 %v694_v19, %v693_v18  ;;  %v695_v23 = vld [vmem:[#allocation9 + $0x90] sm:$0xff]  ;;  %v696_v24 = vld [vmem:[#allocation9 + $0x98] sm:$0xff]  ;;  %v698_v27 = vld [vmem:[#allocation9 + $0xa8] sm:$0xff] }
  0x5f   :  { %v1197_v25 = vpack.c.bf16 %v696_v24, %v695_v23  ;;  %v1274_v28 = vld [vmem:[#allocation3 + $0x50] ss:$8 sps:$4 sm:$0xff]   ;;  %v1275_v29 = vld [vmem:[#allocation3 + $0x64] ss:$8 sps:$4 sm:$0xff]   ;;  %v1200_v30 = vpack.c.bf16 %v698_v27, %v697_v26  ;;  %v1277_v36 = vld [vmem:[#allocation3 + $0x60] ss:$8 sps:$4 sm:$0xff]  }
  0x60   :  { %1235 = vmatpush1.bf16.msra.mxu1 %v1176_v62  ;;  %v699_v31 = vld [vmem:[#allocation9 + $0xb0] sm:$0xff]  ;;  %v700_v32 = vld [vmem:[#allocation9 + $0xb8] sm:$0xff]  ;;  %v701_v34 = vld [vmem:[#allocation9 + $0xc0] sm:$0xff] }
  0x61   :  { %1068 = vmatpush3.bf16.msra.mxu0 %v214_v38  ;;  %1220 = vmatprep.subr.bf16.mxu1 %v1429_v49  ;;  %v1203_v33 = vpack.c.bf16 %v700_v32, %v699_v31  ;;  %v702_v35 = vld [vmem:[#allocation9 + $0xc8] sm:$0xff]  ;;  %v1278_v37 = vld [vmem:[#allocation3 + $0x74] ss:$8 sps:$4 sm:$0xff]   ;;  %v705_v42 = vld [vmem:[#allocation9 + $0xe0] sm:$0xff] }
  0x62   :  { %1069 = vmatprep.subr.bf16.mxu0 %v223_v40  ;;  %v1206_v38 = vpack.c.bf16 %v702_v35, %v701_v34  ;;  %v703_v39 = vld [vmem:[#allocation9 + $0xd0] sm:$0xff]  ;;  %v704_v40 = vld [vmem:[#allocation9 + $0xd8] sm:$0xff]  ;;  %v706_v43 = vld [vmem:[#allocation9 + $0xe8] sm:$0xff] }
  0x63   :  { %v1209_v41 = vpack.c.bf16 %v704_v40, %v703_v39  ;;  %v1281_v45 = vld [vmem:[#allocation3 + $0x84] ss:$8 sps:$4 sm:$0xff]   ;;  %v1283_v47 = vld [vmem:[#allocation3 + $0x80] ss:$8 sps:$4 sm:$0xff]   ;;  %v1290_v53 = vld [vmem:[#allocation3 + $0xb4] ss:$8 sps:$4 sm:$0xff]  }
  0x64   :  { %1236 = vmatpush1.bf16.msra.mxu1 %v1179_v1  ;;  %v1289_v52 = vld [vmem:[#allocation3 + $0xa0] ss:$8 sps:$4 sm:$0xff]   ;;  %v708_v55 = vld [vmem:[#allocation9 + $0xf8] sm:$0xff]  ;;  %v1293_v58 = vld [vmem:[#allocation3 + $0xc4] ss:$8 sps:$4 sm:$0xff]  }
  0x65   :  { %1070 = vmatpush3.bf16.msra.mxu0 %v215_v44  ;;  %1221 = vmatprep.subr.bf16.mxu1 %v1429_v49  ;;  %v1280_v44 = vld [vmem:[#allocation3 + $0x70] ss:$8 sps:$4 sm:$0xff]   ;;  %v1296_v59 = vld [vmem:[#allocation3 + $0xd4] ss:$8 sps:$4 sm:$0xff]   ;;  %v1301_v63 = vld [vmem:[#allocation3 + $0xe0] ss:$8 sps:$4 sm:$0xff]  }
  0x66   :  { %1071 = vmatprep.subr.bf16.mxu0 %v224_v46  ;;  %v1212_v46 = vpack.c.bf16 %v706_v43, %v705_v42  ;;  %v1302_v0 = vld [vmem:[#allocation3 + $0xf4] ss:$8 sps:$4 sm:$0xff]   ;;  %v645_v2 = vld [vmem:[#allocation8] sm:$0xff]  ;;  %v646_v7 = vld [vmem:[#allocation8 + $0x8] sm:$0xff] }
  0x67   :  { %v647_v10 = vld [vmem:[#allocation8 + $0x10] sm:$0xff]  ;;  %v648_v15 = vld [vmem:[#allocation8 + $0x18] sm:$0xff] }
  0x68   :  { %1237 = vmatpush1.bf16.msra.mxu1 %v1182_v6 }
  0x69   :  { %1072 = vmatpush3.bf16.msra.mxu0 %v216_v48  ;;  %1222 = vmatprep.subr.bf16.mxu1 %v1429_v49  ;;  %v1284_v48 = vld [vmem:[#allocation3 + $0x94] ss:$8 sps:$4 sm:$0xff]  }
  0x6a   :  { %1169 = vmatprep.subr.bf16.mxu0 %v1429_v49 }
  0x6c   :  { %418 = vmatmul.mubr.bf16.vlgmr.msra.gmra.mrb[0].mxu0 %v1257_v50  ;;  %1238 = vmatpush1.bf16.msra.mxu1 %v1185_v9  ;;  %v1286_v50 = vld [vmem:[#allocation3 + $0x90] ss:$8 sps:$4 sm:$0xff]  }
  0x6d   :  { %425 = vmatprep.mubr.bf16.mxu0 %v1260_v51  ;;  %1171 = vmatpush1.bf16.msra.mxu0 %v1170_v54  ;;  %v1287_v51 = vld [vmem:[#allocation3 + $0xa4] ss:$8 sps:$4 sm:$0xff]   ;;  %v707_v54 = vld [vmem:[#allocation9 + $0xf0] sm:$0xff] }
  0x6e   :  { %1172 = vmatprep.subr.bf16.mxu0 %v1429_v49  ;;  %1223 = vmatprep.subr.bf16.mxu1 %v1429_v49  ;;  %v1215_v56 = vpack.c.bf16 %v708_v55, %v707_v54  ;;  %v658_v55 = vld [vmem:[#allocation8 + $0x68] sm:$0xff] }
  0x70   :  { %1239 = vmatpush1.bf16.msra.mxu1 %v1188_v14 }
  0x71   :  { %1174 = vmatpush1.bf16.msra.mxu0 %v1173_v57  ;;  %1224 = vmatprep.subr.bf16.mxu1 %v1429_v49  ;;  %v1292_v57 = vld [vmem:[#allocation3 + $0xb0] ss:$8 sps:$4 sm:$0xff]  }
  0x72   :  { %1175 = vmatprep.subr.bf16.mxu0 %v1429_v49 }
  0x74   :  { %426 = vmatmul.mubr.bf16.gmra.mrb[4].mxu0 %v1262_v60  ;;  %1240 = vmatpush1.bf16.msra.mxu1 %v1191_v17  ;;  %v1298_v60 = vld [vmem:[#allocation3 + $0xd0] ss:$8 sps:$4 sm:$0xff]  }
  0x75   :  { %433 = vmatprep.mubr.bf16.mxu0 %v1263_v61  ;;  %1177 = vmatpush1.bf16.msra.mxu0 %v1176_v62  ;;  %v1299_v61 = vld [vmem:[#allocation3 + $0xe4] ss:$8 sps:$4 sm:$0xff]  }
  0x76   :  { %1178 = vmatprep.subr.bf16.mxu0 %v1429_v49  ;;  %1225 = vmatprep.subr.bf16.mxu1 %v1429_v49  ;;  %v649_v62 = vld [vmem:[#allocation8 + $0x20] sm:$0xff] }
  0x77   :  { %800 = vmatprep.mubr.f32.mxu1 %v649_v62  ;;  %v660_v62 = vld [vmem:[#allocation8 + $0x78] sm:$0xff] }
  0x78   :  { %1241 = vmatpush1.bf16.msra.mxu1 %v1194_v22 }
  0x79   :  { %1180 = vmatpush1.bf16.msra.mxu0 %v1179_v1  ;;  %1226 = vmatprep.subr.bf16.mxu1 %v1429_v49  ;;  %v1304_v1 = vld [vmem:[#allocation3 + $0xf0] ss:$8 sps:$4 sm:$0xff]  }
  0x7a   :  { %1181 = vmatprep.subr.bf16.mxu0 %v1429_v49 }
  0x7c   :  { %434 = vmatmul.mubr.bf16.gmra.mrb[8].mxu0 %v1265_v4  ;;  %1242 = vmatpush1.bf16.msra.mxu1 %v1197_v25 }
  0x7d   :  { %441 = vmatprep.mubr.bf16.mxu0 %v1266_v5  ;;  %1183 = vmatpush1.bf16.msra.mxu0 %v1182_v6 }
  0x7e   :  { %1184 = vmatprep.subr.bf16.mxu0 %v1429_v49  ;;  %1227 = vmatprep.subr.bf16.mxu1 %v1429_v49 }
  0x80   :  { %1243 = vmatpush1.bf16.msra.mxu1 %v1200_v30 }
  0x81   :  { %1186 = vmatpush1.bf16.msra.mxu0 %v1185_v9  ;;  %1228 = vmatprep.subr.bf16.mxu1 %v1429_v49 }
  0x82   :  { %1187 = vmatprep.subr.bf16.mxu0 %v1429_v49 }
  0x84   :  { %442 = vmatmul.mubr.bf16.gmra.mrb[12].mxu0 %v1268_v12  ;;  %1244 = vmatpush1.bf16.msra.mxu1 %v1203_v33 }
  0x85   :  { %449 = vmatprep.mubr.bf16.mxu0 %v1269_v13  ;;  %1189 = vmatpush1.bf16.msra.mxu0 %v1188_v14 }
  0x86   :  { %1190 = vmatprep.subr.bf16.mxu0 %v1429_v49  ;;  %1229 = vmatprep.subr.bf16.mxu1 %v1429_v49 }
  0x88   :  { %1245 = vmatpush1.bf16.msra.mxu1 %v1206_v38 }
  0x89   :  { %1192 = vmatpush1.bf16.msra.mxu0 %v1191_v17  ;;  %1230 = vmatprep.subr.bf16.mxu1 %v1429_v49 }
  0x8a   :  { %1193 = vmatprep.subr.bf16.mxu0 %v1429_v49 }
  0x8c   :  { %450 = vmatmul.mubr.bf16.gmra.mrb[16].mxu0 %v1271_v20  ;;  %1246 = vmatpush1.bf16.msra.mxu1 %v1209_v41 }
  0x8d   :  { %457 = vmatprep.mubr.bf16.mxu0 %v1272_v21  ;;  %1195 = vmatpush1.bf16.msra.mxu0 %v1194_v22  ;;  %v650_v22 = vld [vmem:[#allocation8 + $0x28] sm:$0xff] }
  0x8e   :  { %1196 = vmatprep.subr.bf16.mxu0 %v1429_v49  ;;  %1231 = vmatprep.subr.bf16.mxu1 %v1429_v49 }
  0x90   :  { %1247 = vmatpush1.bf16.msra.mxu1 %v1212_v46 }
  0x91   :  { %1198 = vmatpush1.bf16.msra.mxu0 %v1197_v25  ;;  %1232 = vmatprep.subr.bf16.mxu1 %v1429_v49  ;;  %v651_v25 = vld [vmem:[#allocation8 + $0x30] sm:$0xff] }
  0x92   :  { %1199 = vmatprep.subr.bf16.mxu0 %v1429_v49 }
  0x94   :  { %458 = vmatmul.mubr.bf16.gmra.mrb[20].mxu0 %v1274_v28  ;;  %1248 = vmatpush1.bf16.msra.mxu1 %v1215_v56 }
  0x95   :  { %465 = vmatprep.mubr.bf16.mxu0 %v1275_v29  ;;  %1201 = vmatpush1.bf16.msra.mxu0 %v1200_v30  ;;  %v652_v30 = vld [vmem:[#allocation8 + $0x38] sm:$0xff] }
  0x96   :  { %1202 = vmatprep.subr.bf16.mxu0 %v1429_v49 }
  0x99   :  { %1204 = vmatpush1.bf16.msra.mxu0 %v1203_v33  ;;  %v653_v33 = vld [vmem:[#allocation8 + $0x40] sm:$0xff] }
  0x9a   :  { %1205 = vmatprep.subr.bf16.mxu0 %v1429_v49 }
  0x9c   :  { %466 = vmatmul.mubr.bf16.gmra.mrb[24].mxu0 %v1277_v36 }
  0x9d   :  { %473 = vmatprep.mubr.bf16.mxu0 %v1278_v37  ;;  %1207 = vmatpush1.bf16.msra.mxu0 %v1206_v38  ;;  %v654_v38 = vld [vmem:[#allocation8 + $0x48] sm:$0xff] }
  0x9e   :  { %1208 = vmatprep.subr.bf16.mxu0 %v1429_v49 }
  0xa1   :  { %1210 = vmatpush1.bf16.msra.mxu0 %v1209_v41  ;;  %v655_v41 = vld [vmem:[#allocation8 + $0x50] sm:$0xff] }
  0xa2   :  { %1211 = vmatprep.subr.bf16.mxu0 %v1429_v49 }
  0xa4   :  { %474 = vmatmul.mubr.bf16.gmra.mrb[28].mxu0 %v1280_v44 }
  0xa5   :  { %481 = vmatprep.mubr.bf16.mxu0 %v1281_v45  ;;  %1213 = vmatpush1.bf16.msra.mxu0 %v1212_v46  ;;  %v656_v46 = vld [vmem:[#allocation8 + $0x58] sm:$0xff] }
  0xa6   :  { %1214 = vmatprep.subr.bf16.mxu0 %v1429_v49  ;;  %v1295_v49 = vld [vmem:[#allocation3 + $0xc0] ss:$8 sps:$4 sm:$0xff]  }
  0xa9   :  { %1216 = vmatpush1.bf16.msra.mxu0 %v1215_v56 }
  0xac   :  { %482 = vmatmul.mubr.bf16.gmra.mrb[32].mxu0 %v1283_v47 }
  0xad   :  { %489 = vmatprep.mubr.bf16.mxu0 %v1284_v48 }
  0xb4   :  { %490 = vmatmul.mubr.bf16.gmra.mrb[36].mxu0 %v1286_v50  ;;  %v657_v50 = vld [vmem:[#allocation8 + $0x60] sm:$0xff] }
  0xb5   :  { %497 = vmatprep.mubr.bf16.mxu0 %v1287_v51 }
  0xbc   :  { %498 = vmatmul.mubr.bf16.gmra.mrb[40].mxu0 %v1289_v52 }
  0xbd   :  { %505 = vmatprep.mubr.bf16.mxu0 %v1290_v53 }
  0xc4   :  { %506 = vmatmul.mubr.bf16.gmra.mrb[44].mxu0 %v1292_v57 }
  0xc5   :  { %513 = vmatprep.mubr.bf16.mxu0 %v1293_v58  ;;  %v659_v58 = vld [vmem:[#allocation8 + $0x70] sm:$0xff] }
  0xcc   :  { %514 = vmatmul.mubr.bf16.gmra.mrb[48].mxu0 %v1295_v49 }
  0xcd   :  { %521 = vmatprep.mubr.bf16.mxu0 %v1296_v59 }
  0xd4   :  { %522 = vmatmul.mubr.bf16.gmra.mrb[52].mxu0 %v1298_v60 }
  0xd5   :  { %529 = vmatprep.mubr.bf16.mxu0 %v1299_v61 }
  0xdc   :  { %530 = vmatmul.mubr.bf16.gmra.mrb[56].mxu0 %v1301_v63 }
  0xdd   :  { %537 = vmatprep.mubr.bf16.mxu0 %v1302_v0 }
  0xe4   :  { %538 = vmatmul.mubr.bf16.gmra.mrb[60].mxu0 %v1304_v1  ;;  %v661_v1 = vld [vmem:[#allocation8 + $0x80] sm:$0xff] }
  0xe5   :  { %780 = vmatprep.mubr.f32.mxu0 %v645_v2 }
 0x13f   :  { %v1073_v3 = vpop.f32.mrb[0].mxu0 }
 0x140   :  { %v1074_v4 = vpop.f32.mrb[1].mxu0 }
 0x141   :  { %v1075_v5 = vadd.f32 %v1074_v4, %v1073_v3  ;;  %v1076_v6 = vpop.f32.mrb[2].mxu0 }
 0x142   :  { %v1077_v8 = vpop.f32.mrb[3].mxu0 }
 0x143   :  { %v1078_v9 = vadd.f32 %v1077_v8, %v1076_v6  ;;  %781 = vmatmul.mubr.f32.vlgmr.msra.gmra.mrb[64].mxu0 %v1075_v5  ;;  %v662_v6 = vld [vmem:[#allocation8 + $0x88] sm:$0xff] }
 0x144   :  { %785 = vmatprep.mubr.f32.mxu0 %v646_v7 }
 0x147   :  { %v1079_v11 = vpop.f32.mrb[4].mxu0  ;;  %786 = vmatmul.mubr.f32.gmra.mrb[66].mxu0 %v1078_v9  ;;  %v663_v9 = vld [vmem:[#allocation8 + $0x90] sm:$0xff] }
 0x148   :  { %v1080_v12 = vpop.f32.mrb[5].mxu0  ;;  %790 = vmatprep.mubr.f32.mxu0 %v647_v10 }
 0x149   :  { %v1081_v13 = vadd.f32 %v1080_v12, %v1079_v11  ;;  %v1082_v14 = vpop.f32.mrb[6].mxu0 }
 0x14a   :  { %v1083_v16 = vpop.f32.mrb[7].mxu0 }
 0x14b   :  { %v1084_v17 = vadd.f32 %v1083_v16, %v1082_v14  ;;  %791 = vmatmul.mubr.f32.gmra.mrb[68].mxu0 %v1081_v13  ;;  %v664_v14 = vld [vmem:[#allocation8 + $0x98] sm:$0xff] }
 0x14c   :  { %795 = vmatprep.mubr.f32.mxu0 %v648_v15 }
 0x14f   :  { %v1085_v18 = vpop.f32.mrb[8].mxu0  ;;  %796 = vmatmul.mubr.f32.gmra.mrb[70].mxu0 %v1084_v17  ;;  %v665_v17 = vld [vmem:[#allocation8 + $0xa0] sm:$0xff] }
 0x150   :  { %v1086_v19 = vpop.f32.mrb[9].mxu0 }
 0x151   :  { %v1087_v20 = vadd.f32 %v1086_v19, %v1085_v18  ;;  %v1088_v21 = vpop.f32.mrb[10].mxu0 }
 0x152   :  { %v1089_v23 = vpop.f32.mrb[11].mxu0 }
 0x153   :  { %v1090_v24 = vadd.f32 %v1089_v23, %v1088_v21  ;;  %801 = vmatmul.mubr.f32.vlgmr.msra.gmra.mrb[0].mxu1 %v1087_v20 }
 0x154   :  { %805 = vmatprep.mubr.f32.mxu1 %v650_v22  ;;  %v666_v22 = vld [vmem:[#allocation8 + $0xa8] sm:$0xff] }
 0x157   :  { %v1091_v26 = vpop.f32.mrb[12].mxu0  ;;  %806 = vmatmul.mubr.f32.gmra.mrb[2].mxu1 %v1090_v24 }
 0x158   :  { %v1092_v27 = vpop.f32.mrb[13].mxu0  ;;  %810 = vmatprep.mubr.f32.mxu1 %v651_v25  ;;  %v667_v25 = vld [vmem:[#allocation8 + $0xb0] sm:$0xff] }
 0x159   :  { %v1093_v28 = vadd.f32 %v1092_v27, %v1091_v26  ;;  %v1094_v29 = vpop.f32.mrb[14].mxu0 }
 0x15a   :  { %v1095_v31 = vpop.f32.mrb[15].mxu0 }
 0x15b   :  { %v1096_v32 = vadd.f32 %v1095_v31, %v1094_v29  ;;  %811 = vmatmul.mubr.f32.gmra.mrb[4].mxu1 %v1093_v28 }
 0x15c   :  { %815 = vmatprep.mubr.f32.mxu1 %v652_v30  ;;  %v668_v30 = vld [vmem:[#allocation8 + $0xb8] sm:$0xff] }
 0x15f   :  { %v1097_v34 = vpop.f32.mrb[16].mxu0  ;;  %816 = vmatmul.mubr.f32.gmra.mrb[6].mxu1 %v1096_v32 }
 0x160   :  { %v1098_v35 = vpop.f32.mrb[17].mxu0  ;;  %820 = vmatprep.mubr.f32.mxu1 %v653_v33  ;;  %v669_v33 = vld [vmem:[#allocation8 + $0xc0] sm:$0xff] }
 0x161   :  { %v1099_v36 = vadd.f32 %v1098_v35, %v1097_v34  ;;  %v1100_v37 = vpop.f32.mrb[18].mxu0 }
 0x162   :  { %v1101_v39 = vpop.f32.mrb[19].mxu0 }
 0x163   :  { %v1102_v40 = vadd.f32 %v1101_v39, %v1100_v37  ;;  %821 = vmatmul.mubr.f32.gmra.mrb[8].mxu1 %v1099_v36 }
 0x164   :  { %825 = vmatprep.mubr.f32.mxu1 %v654_v38  ;;  %v670_v38 = vld [vmem:[#allocation8 + $0xc8] sm:$0xff] }
 0x167   :  { %v1103_v42 = vpop.f32.mrb[20].mxu0  ;;  %826 = vmatmul.mubr.f32.gmra.mrb[10].mxu1 %v1102_v40 }
 0x168   :  { %v1104_v43 = vpop.f32.mrb[21].mxu0  ;;  %830 = vmatprep.mubr.f32.mxu1 %v655_v41  ;;  %v671_v41 = vld [vmem:[#allocation8 + $0xd0] sm:$0xff] }
 0x169   :  { %v1105_v44 = vadd.f32 %v1104_v43, %v1103_v42  ;;  %v1106_v45 = vpop.f32.mrb[22].mxu0 }
 0x16a   :  { %v1107_v47 = vpop.f32.mrb[23].mxu0 }
 0x16b   :  { %v1108_v48 = vadd.f32 %v1107_v47, %v1106_v45  ;;  %831 = vmatmul.mubr.f32.gmra.mrb[12].mxu1 %v1105_v44 }
 0x16c   :  { %835 = vmatprep.mubr.f32.mxu1 %v656_v46  ;;  %v672_v46 = vld [vmem:[#allocation8 + $0xd8] sm:$0xff] }
 0x16f   :  { %v1109_v51 = vpop.f32.mrb[24].mxu0  ;;  %836 = vmatmul.mubr.f32.gmra.mrb[14].mxu1 %v1108_v48 }
 0x170   :  { %v1110_v52 = vpop.f32.mrb[25].mxu0  ;;  %840 = vmatprep.mubr.f32.mxu1 %v657_v50  ;;  %v673_v50 = vld [vmem:[#allocation8 + $0xe0] sm:$0xff] }
 0x171   :  { %v1111_v53 = vadd.f32 %v1110_v52, %v1109_v51  ;;  %v1112_v54 = vpop.f32.mrb[26].mxu0 }
 0x172   :  { %v1113_v56 = vpop.f32.mrb[27].mxu0 }
 0x173   :  { %v1114_v57 = vadd.f32 %v1113_v56, %v1112_v54  ;;  %841 = vmatmul.mubr.f32.gmra.mrb[16].mxu1 %v1111_v53 }
 0x174   :  { %845 = vmatprep.mubr.f32.mxu1 %v658_v55  ;;  %v674_v55 = vld [vmem:[#allocation8 + $0xe8] sm:$0xff] }
 0x177   :  { %v1115_v49 = vpop.f32.mrb[28].mxu0  ;;  %846 = vmatmul.mubr.f32.gmra.mrb[18].mxu1 %v1114_v57 }
 0x178   :  { %v1116_v59 = vpop.f32.mrb[29].mxu0  ;;  %850 = vmatprep.mubr.f32.mxu1 %v659_v58  ;;  %v675_v58 = vld [vmem:[#allocation8 + $0xf0] sm:$0xff] }
 0x179   :  { %v1117_v60 = vadd.f32 %v1116_v59, %v1115_v49  ;;  %v1118_v61 = vpop.f32.mrb[30].mxu0 }
 0x17a   :  { %v1119_v63 = vpop.f32.mrb[31].mxu0 }
 0x17b   :  { %v1120_v0 = vadd.f32 %v1119_v63, %v1118_v61  ;;  %851 = vmatmul.mubr.f32.gmra.mrb[20].mxu1 %v1117_v60 }
 0x17c   :  { %855 = vmatprep.mubr.f32.mxu1 %v660_v62  ;;  %v676_v62 = vld [vmem:[#allocation8 + $0xf8] sm:$0xff] }
 0x17f   :  { %v1121_v2 = vpop.f32.mrb[32].mxu0  ;;  %856 = vmatmul.mubr.f32.gmra.mrb[22].mxu1 %v1120_v0 }
 0x180   :  { %v1122_v3 = vpop.f32.mrb[33].mxu0  ;;  %860 = vmatprep.mubr.f32.mxu1 %v661_v1  ;;  %v1570_v1 = vld [vmem:[%s1623_s4] ss:$0 sm:$0xff]  ;;  %s1430_s4 = smov [#allocation11]  }
 0x181   :  { %v1123_v4 = vadd.f32 %v1122_v3, %v1121_v2  ;;  %v1124_v5 = vpop.f32.mrb[34].mxu0  ;;  %s1010_s17 = sshll.u32 %s1430_s4, 4  ;;  %s1011_s17 = int_to_ptr.vmem [resolvable:$true] %s1010_s17 }
 0x182   :  { %v1125_v7 = vpop.f32.mrb[35].mxu0  ;;  %s1393_s18 = scalar_lea.vmem %s1011_s17, 4096  ;;  %p1398_p5 = scmp.lt.s32.totalorder %s1011_s17, %s1011_s17 }
 0x183   :  { %v1126_v8 = vadd.f32 %v1125_v7, %v1124_v5  ;;  %861 = vmatmul.mubr.f32.gmra.mrb[24].mxu1 %v1123_v4  ;;  %p1394_p4 = scmp.ne.s32.totalorder %s1011_s17, %s1393_s18  ;;  %p1399_p6 = scmp.lt.s32.totalorder %s1393_s18, %s1393_s18 }
 0x184   :  { %865 = vmatprep.mubr.f32.mxu1 %v662_v6 }
 0x185   :  { %p1400_p7 = por %p1399_p6, %p1398_p5 }
 0x187   :  { %v1127_v10 = vpop.f32.mrb[36].mxu0  ;;  %866 = vmatmul.mubr.f32.gmra.mrb[26].mxu1 %v1126_v8  ;;  %p1401_p8 = pnand %p1400_p7, %p1394_p4 }
 0x188   :  { %v1128_v11 = vpop.f32.mrb[37].mxu0  ;;  %870 = vmatprep.mubr.f32.mxu1 %v663_v9 }
 0x189   :  { %v1129_v12 = vadd.f32 %v1128_v11, %v1127_v10  ;;  %v1130_v13 = vpop.f32.mrb[38].mxu0 }
 0x18a   :  { %v1131_v15 = vpop.f32.mrb[39].mxu0 }
 0x18b   :  { %v1132_v16 = vadd.f32 %v1131_v15, %v1130_v13  ;;  %871 = vmatmul.mubr.f32.gmra.mrb[28].mxu1 %v1129_v12 }
 0x18c   :  { %875 = vmatprep.mubr.f32.mxu1 %v664_v14 }
 0x18f   :  { %v1133_v18 = vpop.f32.mrb[40].mxu0  ;;  %876 = vmatmul.mubr.f32.gmra.mrb[30].mxu1 %v1132_v16 }
 0x190   :  { %v1134_v19 = vpop.f32.mrb[41].mxu0  ;;  %880 = vmatprep.mubr.f32.mxu1 %v665_v17 }
 0x191   :  { %v1135_v20 = vadd.f32 %v1134_v19, %v1133_v18  ;;  %v1136_v21 = vpop.f32.mrb[42].mxu0 }
 0x192   :  { %v1137_v23 = vpop.f32.mrb[43].mxu0 }
 0x193   :  { %v1138_v24 = vadd.f32 %v1137_v23, %v1136_v21  ;;  %881 = vmatmul.mubr.f32.gmra.mrb[32].mxu1 %v1135_v20 }
 0x194   :  { %885 = vmatprep.mubr.f32.mxu1 %v666_v22 }
 0x197   :  { %v1139_v26 = vpop.f32.mrb[44].mxu0  ;;  %886 = vmatmul.mubr.f32.gmra.mrb[34].mxu1 %v1138_v24 }
 0x198   :  { %v1140_v27 = vpop.f32.mrb[45].mxu0  ;;  %890 = vmatprep.mubr.f32.mxu1 %v667_v25 }
 0x199   :  { %v1141_v28 = vadd.f32 %v1140_v27, %v1139_v26  ;;  %v1142_v29 = vpop.f32.mrb[46].mxu0 }
 0x19a   :  { %v1143_v31 = vpop.f32.mrb[47].mxu0 }
 0x19b   :  { %v1144_v32 = vadd.f32 %v1143_v31, %v1142_v29  ;;  %891 = vmatmul.mubr.f32.gmra.mrb[36].mxu1 %v1141_v28 }
 0x19c   :  { %895 = vmatprep.mubr.f32.mxu1 %v668_v30 }
 0x19f   :  { %v1145_v34 = vpop.f32.mrb[48].mxu0  ;;  %896 = vmatmul.mubr.f32.gmra.mrb[38].mxu1 %v1144_v32 }
 0x1a0   :  { %v1146_v35 = vpop.f32.mrb[49].mxu0  ;;  %900 = vmatprep.mubr.f32.mxu1 %v669_v33 }
 0x1a1   :  { %v1147_v36 = vadd.f32 %v1146_v35, %v1145_v34  ;;  %v1148_v37 = vpop.f32.mrb[50].mxu0 }
 0x1a2   :  { %v1149_v39 = vpop.f32.mrb[51].mxu0 }
 0x1a3   :  { %v1150_v40 = vadd.f32 %v1149_v39, %v1148_v37  ;;  %901 = vmatmul.mubr.f32.gmra.mrb[40].mxu1 %v1147_v36 }
 0x1a4   :  { %905 = vmatprep.mubr.f32.mxu1 %v670_v38 }
 0x1a7   :  { %v1151_v42 = vpop.f32.mrb[52].mxu0  ;;  %906 = vmatmul.mubr.f32.gmra.mrb[42].mxu1 %v1150_v40 }
 0x1a8   :  { %v1152_v43 = vpop.f32.mrb[53].mxu0  ;;  %910 = vmatprep.mubr.f32.mxu1 %v671_v41 }
 0x1a9   :  { %v1153_v44 = vadd.f32 %v1152_v43, %v1151_v42  ;;  %v1154_v45 = vpop.f32.mrb[54].mxu0 }
 0x1aa   :  { %v1155_v47 = vpop.f32.mrb[55].mxu0 }
 0x1ab   :  { %v1156_v48 = vadd.f32 %v1155_v47, %v1154_v45  ;;  %911 = vmatmul.mubr.f32.gmra.mrb[44].mxu1 %v1153_v44 }
 0x1ac   :  { %915 = vmatprep.mubr.f32.mxu1 %v672_v46 }
 0x1af   :  { %v1157_v51 = vpop.f32.mrb[56].mxu0  ;;  %916 = vmatmul.mubr.f32.gmra.mrb[46].mxu1 %v1156_v48 }
 0x1b0   :  { %v1158_v52 = vpop.f32.mrb[57].mxu0  ;;  %920 = vmatprep.mubr.f32.mxu1 %v673_v50 }
 0x1b1   :  { %v1159_v53 = vadd.f32 %v1158_v52, %v1157_v51  ;;  %v1160_v54 = vpop.f32.mrb[58].mxu0 }
 0x1b2   :  { %v1161_v56 = vpop.f32.mrb[59].mxu0 }
 0x1b3   :  { %v1162_v57 = vadd.f32 %v1161_v56, %v1160_v54  ;;  %921 = vmatmul.mubr.f32.gmra.mrb[48].mxu1 %v1159_v53 }
 0x1b4   :  { %925 = vmatprep.mubr.f32.mxu1 %v674_v55 }
 0x1b7   :  { %v1163_v49 = vpop.f32.mrb[60].mxu0  ;;  %926 = vmatmul.mubr.f32.gmra.mrb[50].mxu1 %v1162_v57 }
 0x1b8   :  { %v1164_v59 = vpop.f32.mrb[61].mxu0  ;;  %930 = vmatprep.mubr.f32.mxu1 %v675_v58 }
 0x1b9   :  { %v1165_v60 = vadd.f32 %v1164_v59, %v1163_v49  ;;  %v1166_v61 = vpop.f32.mrb[62].mxu0 }
 0x1ba   :  { %v1167_v63 = vpop.f32.mrb[63].mxu0 }
 0x1bb   :  { %v1168_v0 = vadd.f32 %v1167_v63, %v1166_v61  ;;  %931 = vmatmul.mubr.f32.gmra.mrb[52].mxu1 %v1165_v60 }
 0x1bc   :  { %935 = vmatprep.mubr.f32.mxu1 %v676_v62 }
 0x1bf   :  { %936 = vmatmul.mubr.f32.gmra.mrb[54].mxu1 %v1168_v0 }
 0x216   :  { %v782_v2 = vpop.f32.mrb[64].mxu0 }
 0x217   :  { %v783_v3 = vadd.f32 %v1570_v1, %v782_v2  ;;  %v784_v4 = vpop.f32.mrb[65].mxu0 }
 0x219   :  { %v941_v5 = vmax.f32 %v783_v3, 0.0 }
 0x21a   :  { %v787_v6 = vpop.f32.mrb[66].mxu0 }
 0x21b   :  { %973 = vst [vmem:[#allocation11] sm:$0xff] %v941_v5  ;;  %v788_v7 = vadd.f32 %v1570_v1, %v787_v6  ;;  %v789_v8 = vpop.f32.mrb[67].mxu0 }
 0x21d   :  { %v942_v9 = vmax.f32 %v788_v7, 0.0 }
 0x21e   :  { %v792_v10 = vpop.f32.mrb[68].mxu0 }
 0x21f   :  { %974 = vst [vmem:[#allocation11 + $0x8] sm:$0xff] %v942_v9  ;;  %v793_v11 = vadd.f32 %v1570_v1, %v792_v10  ;;  %v794_v12 = vpop.f32.mrb[69].mxu0 }
 0x221   :  { %v943_v13 = vmax.f32 %v793_v11, 0.0 }
 0x222   :  { %v797_v14 = vpop.f32.mrb[70].mxu0 }
 0x223   :  { %975 = vst [vmem:[#allocation11 + $0x10] sm:$0xff] %v943_v13  ;;  %v798_v15 = vadd.f32 %v1570_v1, %v797_v14  ;;  %v799_v16 = vpop.f32.mrb[71].mxu0 }
 0x225   :  { %v944_v17 = vmax.f32 %v798_v15, 0.0 }
 0x226   :  { %v802_v18 = vpop.f32.mrb[0].mxu1 }
 0x227   :  { %976 = vst [vmem:[#allocation11 + $0x18] sm:$0xff] %v944_v17  ;;  %v803_v19 = vadd.f32 %v1570_v1, %v802_v18  ;;  %v804_v20 = vpop.f32.mrb[1].mxu1 }
 0x229   :  { %v945_v21 = vmax.f32 %v803_v19, 0.0 }
 0x22a   :  { %v807_v22 = vpop.f32.mrb[2].mxu1 }
 0x22b   :  { %977 = vst [vmem:[#allocation11 + $0x20] sm:$0xff] %v945_v21  ;;  %v808_v23 = vadd.f32 %v1570_v1, %v807_v22  ;;  %v809_v24 = vpop.f32.mrb[3].mxu1 }
 0x22d   :  { %v946_v25 = vmax.f32 %v808_v23, 0.0 }
 0x22e   :  { %v812_v26 = vpop.f32.mrb[4].mxu1 }
 0x22f   :  { %978 = vst [vmem:[#allocation11 + $0x28] sm:$0xff] %v946_v25  ;;  %v813_v27 = vadd.f32 %v1570_v1, %v812_v26  ;;  %v814_v28 = vpop.f32.mrb[5].mxu1 }
 0x231   :  { %v947_v29 = vmax.f32 %v813_v27, 0.0 }
 0x232   :  { %v817_v30 = vpop.f32.mrb[6].mxu1 }
 0x233   :  { %979 = vst [vmem:[#allocation11 + $0x30] sm:$0xff] %v947_v29  ;;  %v818_v31 = vadd.f32 %v1570_v1, %v817_v30  ;;  %v819_v32 = vpop.f32.mrb[7].mxu1 }
 0x235   :  { %v948_v33 = vmax.f32 %v818_v31, 0.0 }
 0x236   :  { %v822_v34 = vpop.f32.mrb[8].mxu1 }
 0x237   :  { %980 = vst [vmem:[#allocation11 + $0x38] sm:$0xff] %v948_v33  ;;  %v823_v35 = vadd.f32 %v1570_v1, %v822_v34  ;;  %v824_v36 = vpop.f32.mrb[9].mxu1 }
 0x239   :  { %v949_v37 = vmax.f32 %v823_v35, 0.0 }
 0x23a   :  { %v827_v38 = vpop.f32.mrb[10].mxu1 }
 0x23b   :  { %981 = vst [vmem:[#allocation11 + $0x40] sm:$0xff] %v949_v37  ;;  %v828_v39 = vadd.f32 %v1570_v1, %v827_v38  ;;  %v829_v40 = vpop.f32.mrb[11].mxu1 }
 0x23d   :  { %v950_v41 = vmax.f32 %v828_v39, 0.0 }
 0x23e   :  { %v832_v42 = vpop.f32.mrb[12].mxu1 }
 0x23f   :  { %982 = vst [vmem:[#allocation11 + $0x48] sm:$0xff] %v950_v41  ;;  %v833_v43 = vadd.f32 %v1570_v1, %v832_v42  ;;  %v834_v44 = vpop.f32.mrb[13].mxu1 }
 0x241   :  { %v951_v45 = vmax.f32 %v833_v43, 0.0 }
 0x242   :  { %v837_v46 = vpop.f32.mrb[14].mxu1 }
 0x243   :  { %983 = vst [vmem:[#allocation11 + $0x50] sm:$0xff] %v951_v45  ;;  %v838_v47 = vadd.f32 %v1570_v1, %v837_v46  ;;  %v839_v48 = vpop.f32.mrb[15].mxu1 }
 0x245   :  { %v952_v50 = vmax.f32 %v838_v47, 0.0 }
 0x246   :  { %v842_v51 = vpop.f32.mrb[16].mxu1 }
 0x247   :  { %984 = vst [vmem:[#allocation11 + $0x58] sm:$0xff] %v952_v50  ;;  %v843_v52 = vadd.f32 %v1570_v1, %v842_v51  ;;  %v844_v53 = vpop.f32.mrb[17].mxu1 }
 0x249   :  { %v953_v54 = vmax.f32 %v843_v52, 0.0 }
 0x24a   :  { %v847_v55 = vpop.f32.mrb[18].mxu1 }
 0x24b   :  { %985 = vst [vmem:[#allocation11 + $0x60] sm:$0xff] %v953_v54  ;;  %v848_v56 = vadd.f32 %v1570_v1, %v847_v55  ;;  %v849_v57 = vpop.f32.mrb[19].mxu1 }
 0x24d   :  { %v954_v58 = vmax.f32 %v848_v56, 0.0 }
 0x24e   :  { %v852_v49 = vpop.f32.mrb[20].mxu1 }
 0x24f   :  { %986 = vst [vmem:[#allocation11 + $0x68] sm:$0xff] %v954_v58  ;;  %v853_v59 = vadd.f32 %v1570_v1, %v852_v49  ;;  %v854_v60 = vpop.f32.mrb[21].mxu1 }
 0x251   :  { %v955_v61 = vmax.f32 %v853_v59, 0.0 }
 0x252   :  { %v857_v62 = vpop.f32.mrb[22].mxu1 }
 0x253   :  { %987 = vst [vmem:[#allocation11 + $0x70] sm:$0xff] %v955_v61  ;;  %v858_v63 = vadd.f32 %v1570_v1, %v857_v62  ;;  %v859_v0 = vpop.f32.mrb[23].mxu1 }
 0x255   :  { %v956_v2 = vmax.f32 %v858_v63, 0.0 }
 0x256   :  { %v862_v3 = vpop.f32.mrb[24].mxu1 }
 0x257   :  { %988 = vst [vmem:[#allocation11 + $0x78] sm:$0xff] %v956_v2  ;;  %v863_v4 = vadd.f32 %v1570_v1, %v862_v3  ;;  %v864_v5 = vpop.f32.mrb[25].mxu1 }
 0x259   :  { %v957_v6 = vmax.f32 %v863_v4, 0.0 }
 0x25a   :  { %v867_v7 = vpop.f32.mrb[26].mxu1 }
 0x25b   :  { %989 = vst [vmem:[#allocation11 + $0x80] sm:$0xff] %v957_v6  ;;  %v868_v8 = vadd.f32 %v1570_v1, %v867_v7  ;;  %v869_v9 = vpop.f32.mrb[27].mxu1 }
 0x25d   :  { %v958_v10 = vmax.f32 %v868_v8, 0.0 }
 0x25e   :  { %v872_v11 = vpop.f32.mrb[28].mxu1 }
 0x25f   :  { %990 = vst [vmem:[#allocation11 + $0x88] sm:$0xff] %v958_v10  ;;  %v873_v12 = vadd.f32 %v1570_v1, %v872_v11  ;;  %v874_v13 = vpop.f32.mrb[29].mxu1 }
 0x261   :  { %v959_v14 = vmax.f32 %v873_v12, 0.0 }
 0x262   :  { %v877_v15 = vpop.f32.mrb[30].mxu1 }
 0x263   :  { %991 = vst [vmem:[#allocation11 + $0x90] sm:$0xff] %v959_v14  ;;  %v878_v16 = vadd.f32 %v1570_v1, %v877_v15  ;;  %v879_v17 = vpop.f32.mrb[31].mxu1 }
 0x265   :  { %v960_v18 = vmax.f32 %v878_v16, 0.0 }
 0x266   :  { %v882_v19 = vpop.f32.mrb[32].mxu1 }
 0x267   :  { %992 = vst [vmem:[#allocation11 + $0x98] sm:$0xff] %v960_v18  ;;  %v883_v20 = vadd.f32 %v1570_v1, %v882_v19  ;;  %v884_v21 = vpop.f32.mrb[33].mxu1 }
 0x269   :  { %v961_v22 = vmax.f32 %v883_v20, 0.0 }
 0x26a   :  { %v887_v23 = vpop.f32.mrb[34].mxu1 }
 0x26b   :  { %993 = vst [vmem:[#allocation11 + $0xa0] sm:$0xff] %v961_v22  ;;  %v888_v24 = vadd.f32 %v1570_v1, %v887_v23  ;;  %v889_v25 = vpop.f32.mrb[35].mxu1 }
 0x26d   :  { %v962_v26 = vmax.f32 %v888_v24, 0.0 }
 0x26e   :  { %v892_v27 = vpop.f32.mrb[36].mxu1 }
 0x26f   :  { %994 = vst [vmem:[#allocation11 + $0xa8] sm:$0xff] %v962_v26  ;;  %v893_v28 = vadd.f32 %v1570_v1, %v892_v27  ;;  %v894_v29 = vpop.f32.mrb[37].mxu1 }
 0x271   :  { %v963_v30 = vmax.f32 %v893_v28, 0.0 }
 0x272   :  { %v897_v31 = vpop.f32.mrb[38].mxu1 }
 0x273   :  { %995 = vst [vmem:[#allocation11 + $0xb0] sm:$0xff] %v963_v30  ;;  %v898_v32 = vadd.f32 %v1570_v1, %v897_v31  ;;  %v899_v33 = vpop.f32.mrb[39].mxu1 }
 0x275   :  { %v964_v34 = vmax.f32 %v898_v32, 0.0 }
 0x276   :  { %v902_v35 = vpop.f32.mrb[40].mxu1 }
 0x277   :  { %996 = vst [vmem:[#allocation11 + $0xb8] sm:$0xff] %v964_v34  ;;  %v903_v36 = vadd.f32 %v1570_v1, %v902_v35  ;;  %v904_v37 = vpop.f32.mrb[41].mxu1 }
 0x279   :  { %v965_v38 = vmax.f32 %v903_v36, 0.0 }
 0x27a   :  { %v907_v39 = vpop.f32.mrb[42].mxu1 }
 0x27b   :  { %997 = vst [vmem:[#allocation11 + $0xc0] sm:$0xff] %v965_v38  ;;  %v908_v40 = vadd.f32 %v1570_v1, %v907_v39  ;;  %v909_v41 = vpop.f32.mrb[43].mxu1 }
 0x27d   :  { %v966_v42 = vmax.f32 %v908_v40, 0.0 }
 0x27e   :  { %v912_v43 = vpop.f32.mrb[44].mxu1 }
 0x27f   :  { %998 = vst [vmem:[#allocation11 + $0xc8] sm:$0xff] %v966_v42  ;;  %v913_v44 = vadd.f32 %v1570_v1, %v912_v43  ;;  %v914_v45 = vpop.f32.mrb[45].mxu1 }
 0x281   :  { %v967_v46 = vmax.f32 %v913_v44, 0.0 }
 0x282   :  { %v917_v47 = vpop.f32.mrb[46].mxu1 }
 0x283   :  { %999 = vst [vmem:[#allocation11 + $0xd0] sm:$0xff] %v967_v46  ;;  %v918_v48 = vadd.f32 %v1570_v1, %v917_v47  ;;  %v919_v50 = vpop.f32.mrb[47].mxu1 }
 0x285   :  { %v968_v51 = vmax.f32 %v918_v48, 0.0 }
 0x286   :  { %v922_v52 = vpop.f32.mrb[48].mxu1 }
 0x287   :  { %1000 = vst [vmem:[#allocation11 + $0xd8] sm:$0xff] %v968_v51  ;;  %v923_v53 = vadd.f32 %v1570_v1, %v922_v52  ;;  %v924_v54 = vpop.f32.mrb[49].mxu1 }
 0x289   :  { %v969_v55 = vmax.f32 %v923_v53, 0.0 }
 0x28a   :  { %v927_v56 = vpop.f32.mrb[50].mxu1 }
 0x28b   :  { %1001 = vst [vmem:[#allocation11 + $0xe0] sm:$0xff] %v969_v55  ;;  %v928_v57 = vadd.f32 %v1570_v1, %v927_v56  ;;  %v929_v58 = vpop.f32.mrb[51].mxu1 }
 0x28d   :  { %v970_v49 = vmax.f32 %v928_v57, 0.0 }
 0x28e   :  { %v932_v59 = vpop.f32.mrb[52].mxu1 }
 0x28f   :  { %1002 = vst [vmem:[#allocation11 + $0xe8] sm:$0xff] %v970_v49  ;;  %v933_v60 = vadd.f32 %v1570_v1, %v932_v59  ;;  %v934_v61 = vpop.f32.mrb[53].mxu1 }
 0x291   :  { %v971_v62 = vmax.f32 %v933_v60, 0.0 }
 0x292   :  { %v937_v63 = vpop.f32.mrb[54].mxu1 }
 0x293   :  { %1003 = vst [vmem:[#allocation11 + $0xf0] sm:$0xff] %v971_v62  ;;  %v938_v0 = vadd.f32 %v1570_v1, %v937_v63  ;;  %v939_v2 = vpop.f32.mrb[55].mxu1 }
 0x295   :  { %v972_v3 = vmax.f32 %v938_v0, 0.0 }
 0x297   :  { %1004 = vst [vmem:[#allocation11 + $0xf8] sm:$0xff] %v972_v3 }
 0x298   :  { %1404 = shalt.err (!%p1401_p8)
}
 0x299   :  { %s1405_s22 = scalar_lea.hbm %s1624_s5, 4096 }
 0x29a   :  { %p1406_p9 = scmp.ne.s32.totalorder %s1624_s5, %s1405_s22  ;;  %p1409_p10 = scmp.lt.u32.totalorder %s1405_s22, %s1624_s5 }
 0x29c   :  { %p1411_p11 = pnand %p1409_p10, %p1406_p9 }
 0x29e   :  { %1414 = shalt.err (!%p1411_p11)
}
 0x29f   :  { %1016 = dma.vmem_to_hbm [thread:$0]  %s1011_s17, 4096, %s1624_s5, [#allocation5], %s1425_s30, %s1425_s30, %s1426_s6  }
 0x2a0   :  { %1421 = dma.done.wait [#allocation5], 4096  }
 0x2a1   :  { %1422 = vsyncadd [#allocation5], 4294963200 }
 0x2a2   :  { %1020 = vsyncpa [#allocation4], 1 }
 0x2a3   :  { %1021 = vsyncpa [#allocation7], 1 }
 0x2a4   :  { %1022 = vsyncpa [#allocation10], 1 }
 0x2a5   :  { %1023 = vsyncpa [#allocation5], 1 }

</bundles_post_ra>
